<compile_context>
chip_gen: v6e
topology: v6e:2x2x1
jax: 0.10.0
libtpu: 0.0.40
codegen_flags: <defaults>
</compile_context>

<pallas_src>
import functools

import jax
import jax.numpy as jnp
from jax import lax
from jax.experimental import pallas as pl
from jax.experimental.pallas import tpu as pltpu  # noqa: F401  (TPU backend)


# ---------------------------------------------------------------------------
# Kernel
# ---------------------------------------------------------------------------
def lstm_net_kernel(x_ref, wih_ref, b_ref, whh_ref, w1_ref, b1_ref, w2_ref,
                    b2_ref, out_ref, *, seq_len, hidden, use_sigmoid,
                    use_tanh):
  """Serial LSTM recurrence (h, c carried in vregs) + MLP head, all in VMEM."""
  H = hidden
  B = out_ref.shape[0]

  # Tiny loop-invariant vectors (one vreg each for H=32): hoist once.
  wih = wih_ref[...]                                   # (1, 4H)
  b_comb = b_ref[...]                                  # (1, 4H)

  h0 = jnp.zeros((B, H), jnp.float32)
  c0 = jnp.zeros((B, H), jnp.float32)

  def step(t, carry):
    h, c = carry
    x_t = x_ref[t]                                     # (B, 1)
    # Input projection computed in-kernel (VPU broadcast mul-add, ~free) plus
    # the recurrent matmul; whh_ref is read per step (VMEM-resident tile, no
    # vreg hoist -> no spill churn across the unrolled loop).
    gates = (x_t * wih + b_comb
             + jnp.dot(h, whh_ref[...],
                       preferred_element_type=jnp.float32))       # (B, 4H)
    # Packed gate order (i, f, o, g): one sigmoid over the first three blocks,
    # one tanh over the last. Gates stay at 4H lanes (no per-gate padding).
    sig = jax.nn.sigmoid(gates[:, :3 * H])
    g_g = jnp.tanh(gates[:, 3 * H:])
    i_g = sig[:, :H]
    f_g = sig[:, H:2 * H]
    o_g = sig[:, 2 * H:]
    c_new = f_g * c + i_g * g_g
    h_new = o_g * jnp.tanh(c_new)
    return h_new, c_new

  # Full unroll only for short sequences; cap at 8 for cross-iteration LLO
  # visibility without blowing up instruction footprint / vreg live ranges.
  unroll = seq_len if seq_len <= 8 else 8
  h_final, _ = lax.fori_loop(0, seq_len, step, (h0, c0), unroll=unroll)

  # Dropout layers are identity at inference.
  y1 = jnp.dot(h_final, w1_ref[...],
               preferred_element_type=jnp.float32) + b1_ref[...]
  y1 = jnp.maximum(y1, 0.0)                            # ReLU
  out = jnp.dot(y1, w2_ref[...],
                preferred_element_type=jnp.float32) + b2_ref[...]
  if use_sigmoid:
    out = jax.nn.sigmoid(out)
  elif use_tanh:
    out = jnp.tanh(out)
  out_ref[...] = out.astype(out_ref.dtype)


# ---------------------------------------------------------------------------
# Wrapper: parameter packing + pallas_call
# ---------------------------------------------------------------------------
def pack_params(raw_params):
  """PyTorch layout -> kernel layout.

  Gate reorder (i,f,g,o)->(i,f,o,g); NO lane padding (gates stay at 4H lanes);
  matrices pre-transposed so all kernel matmuls are plain `rows @ cols`.
  """
  w_ih, w_hh, b_ih, b_hh, w1, b1, w2, b2 = raw_params

  def reorder(a):                           # gate axis (4H) is axis 0
    i, f, g, o = jnp.split(a, 4, axis=0)
    return jnp.concatenate([i, f, o, g], axis=0)

  wih = reorder(w_ih)[:, 0][None, :]                 # (1, 4H)  input_size == 1
  b_comb = reorder(b_ih + b_hh)[None, :]             # (1, 4H)
  whh_t = reorder(w_hh).T                            # (H, 4H)
  return (wih.astype(jnp.float32), b_comb.astype(jnp.float32),
          whh_t.astype(jnp.float32), w1.T, b1[None, :], w2.T, b2[None, :])


def lstm_net_forward(x, raw_params, use_sigmoid=True, use_tanh=False):
  """x: (B, S, 1) float32 (batch_first, input_size=1). Returns (B, O)."""
  B, S, I = x.shape
  assert I == 1, "nn.LSTM(input_size=1)"
  H = raw_params[1].shape[1]
  O = raw_params[6].shape[0]
  wih, b_comb, whh_t, w1_t, b1, w2_t, b2 = pack_params(raw_params)

  # Time-major raw input only (S, B, 1): per-step input projection now happens
  # inside the kernel, so nothing bigger than the raw x crosses HBM.
  x_tm = jnp.transpose(x, (1, 0, 2)).astype(jnp.float32)        # (S, B, 1)

  operands = (x_tm, wih, b_comb, whh_t, w1_t, b1, w2_t, b2)

  flops = 2 * S * B * H * 4 * H + 2 * B * H * H + 2 * B * H * O
  transcendentals = S * B * 5 * H + (B * O if (use_sigmoid or use_tanh) else 0)
  bytes_accessed = (sum(int(a.size) * a.dtype.itemsize for a in operands)
                    + B * O * 4)

  def full_spec(shape):
    return pl.BlockSpec(shape, lambda: tuple(0 for _ in shape))

  kernel = functools.partial(
      lstm_net_kernel, seq_len=S, hidden=H,
      use_sigmoid=use_sigmoid, use_tanh=use_tanh)

  return pl.pallas_call(
      kernel,
      out_shape=jax.ShapeDtypeStruct((B, O), jnp.float32),
      in_specs=[full_spec(a.shape) for a in operands],
      out_specs=full_spec((B, O)),
      cost_estimate=pl.CostEstimate(flops=int(flops),
                                    transcendentals=int(transcendentals),
                                    bytes_accessed=int(bytes_accessed)),
  )(*operands)


# ---------------------------------------------------------------------------
# Pure-JAX reference (PyTorch layout & gate order) + param init
# ---------------------------------------------------------------------------
def reference_forward(x, raw_params, use_sigmoid=True, use_tanh=False):
  w_ih, w_hh, b_ih, b_hh, w1, b1, w2, b2 = raw_params
  B, S, _ = x.shape
  H = w_hh.shape[1]
  h = jnp.zeros((B, H), jnp.float32)
  c = jnp.zeros((B, H), jnp.float32)
  for t in range(S):
    gates = x[:, t, :] @ w_ih.T + h @ w_hh.T + b_ih + b_hh     # (B, 4H)
    i_g = jax.nn.sigmoid(gates[:, 0 * H:1 * H])
    f_g = jax.nn.sigmoid(gates[:, 1 * H:2 * H])
    g_g = jnp.tanh(gates[:, 2 * H:3 * H])
    o_g = jax.nn.sigmoid(gates[:, 3 * H:4 * H])
    c = f_g * c + i_g * g_g
    h = o_g * jnp.tanh(c)
  y = jnp.maximum(h @ w1.T + b1, 0.0)
  out = y @ w2.T + b2
  if use_sigmoid:
    out = jax.nn.sigmoid(out)
  elif use_tanh:
    out = jnp.tanh(out)
  return out


def init_params(key, hidden_dim, output_dim=1):
  """PyTorch-shaped params: W_ih (4H,1), W_hh (4H,H), b_ih/b_hh (4H,),
     fc1 (H,H)/(H,), fc2 (O,H)/(O,)."""
  H, O = hidden_dim, output_dim
  ks = jax.random.split(key, 8)
  s = 1.0 / jnp.sqrt(H)
  w_ih = jax.random.uniform(ks[0], (4 * H, 1), jnp.float32, -s, s)
  w_hh = jax.random.uniform(ks[1], (4 * H, H), jnp.float32, -s, s)
  b_ih = jax.random.uniform(ks[2], (4 * H,), jnp.float32, -s, s)
  b_hh = jax.random.uniform(ks[3], (4 * H,), jnp.float32, -s, s)
  w1 = jax.random.uniform(ks[4], (H, H), jnp.float32, -s, s)
  b1 = jax.random.uniform(ks[5], (H,), jnp.float32, -s, s)
  w2 = jax.random.uniform(ks[6], (O, H), jnp.float32, -s, s)
  b2 = jax.random.uniform(ks[7], (O,), jnp.float32, -s, s)
  return (w_ih, w_hh, b_ih, b_hh, w1, b1, w2, b2)


if __name__ == "__main__":
  B, S, H, O = 2, 8, 32, 1          # n_layers=1 (module reshape requires it)
  key = jax.random.PRNGKey(0)
  k_x, k_p = jax.random.split(key)
  x = jax.random.normal(k_x, (B, S, 1), jnp.float32)
  params = init_params(k_p, H, O)

  out = jax.block_until_ready(lstm_net_forward(x, params, use_sigmoid=True))
  ref = reference_forward(x, params, use_sigmoid=True)

  assert out.shape == (B, O)
  assert jnp.allclose(out, ref, rtol=1e-4, atol=1e-5), (out, ref)
  print("KERNEL_OK")
</pallas_src>

<mosaic_0001>
module attributes {stable_mosaic.version = 11 : i64} {
  func.func @lstm_net_kernel(%arg0: memref<8x2x1xf32, #tpu.memory_space<vmem>>, %arg1: memref<1x128xf32, #tpu.memory_space<vmem>>, %arg2: memref<1x128xf32, #tpu.memory_space<vmem>>, %arg3: memref<32x128xf32, #tpu.memory_space<vmem>>, %arg4: memref<32x32xf32, #tpu.memory_space<vmem>>, %arg5: memref<1x32xf32, #tpu.memory_space<vmem>>, %arg6: memref<32x1xf32, #tpu.memory_space<vmem>>, %arg7: memref<1x1xf32, #tpu.memory_space<vmem>>, %arg8: memref<2x1xf32, #tpu.memory_space<vmem>>) attributes {dimension_semantics = [], scalar_prefetch = 0 : i64, scratch_operands = 0 : i64, tpu.core_type = #tpu.core_type<tc>} {
    %c0 = arith.constant 0 : index
    %c0_0 = arith.constant 0 : index
    %0 = vector.load %arg1[%c0, %c0_0] : memref<1x128xf32, #tpu.memory_space<vmem>>, vector<1x128xf32>
    %c0_1 = arith.constant 0 : index
    %c0_2 = arith.constant 0 : index
    %1 = vector.load %arg2[%c0_1, %c0_2] : memref<1x128xf32, #tpu.memory_space<vmem>>, vector<1x128xf32>
    %cst = arith.constant 0.000000e+00 : f32
    %2 = vector.broadcast %cst : f32 to vector<2x32xf32>
    %cst_3 = arith.constant 0.000000e+00 : f32
    %3 = vector.broadcast %cst_3 : f32 to vector<2x32xf32>
    %c0_i32 = arith.constant 0 : i32
    %4 = arith.index_cast %c0_i32 : i32 to index
    %c0_4 = arith.constant 0 : index
    %c0_5 = arith.constant 0 : index
    %5 = vector.load %arg0[%4, %c0_4, %c0_5] : memref<8x2x1xf32, #tpu.memory_space<vmem>>, vector<1x2x1xf32>
    %6 = vector.shape_cast %5 : vector<1x2x1xf32> to vector<2x1xf32>
    %7 = vector.broadcast %6 : vector<2x1xf32> to vector<2x128xf32>
    %8 = vector.broadcast %0 : vector<1x128xf32> to vector<2x128xf32>
    %9 = arith.mulf %7, %8 : vector<2x128xf32>
    %10 = vector.broadcast %1 : vector<1x128xf32> to vector<2x128xf32>
    %11 = arith.addf %9, %10 : vector<2x128xf32>
    %c0_6 = arith.constant 0 : index
    %c0_7 = arith.constant 0 : index
    %12 = vector.load %arg3[%c0_6, %c0_7] : memref<32x128xf32, #tpu.memory_space<vmem>>, vector<32x128xf32>
    %cst_8 = arith.constant dense<0.000000e+00> : vector<2x128xf32>
    %13 = tpu.matmul %2, %12, %cst_8 {dimension_numbers = #tpu.dot_dimension_numbers<[1], [0], [0], [1], [0, 0, 1, 1], [], []>} : vector<2x32xf32>, vector<32x128xf32>, vector<2x128xf32> -> vector<2x128xf32>
    %14 = arith.addf %11, %13 : vector<2x128xf32>
    %15 = vector.extract_strided_slice %14 {offsets = [0, 0], sizes = [2, 96], strides = [1, 1]} : vector<2x128xf32> to vector<2x96xf32>
    %16 = arith.negf %15 : vector<2x96xf32>
    %17 = math.exp %16 : vector<2x96xf32>
    %cst_9 = arith.constant 1.000000e+00 : f32
    %18 = vector.broadcast %cst_9 : f32 to vector<2x96xf32>
    %19 = arith.addf %18, %17 : vector<2x96xf32>
    %20 = arith.divf %18, %19 : vector<2x96xf32>
    %21 = vector.extract_strided_slice %14 {offsets = [0, 96], sizes = [2, 32], strides = [1, 1]} : vector<2x128xf32> to vector<2x32xf32>
    %22 = math.tanh %21 : vector<2x32xf32>
    %23 = vector.extract_strided_slice %20 {offsets = [0, 0], sizes = [2, 32], strides = [1, 1]} : vector<2x96xf32> to vector<2x32xf32>
    %24 = vector.extract_strided_slice %20 {offsets = [0, 32], sizes = [2, 32], strides = [1, 1]} : vector<2x96xf32> to vector<2x32xf32>
    %25 = vector.extract_strided_slice %20 {offsets = [0, 64], sizes = [2, 32], strides = [1, 1]} : vector<2x96xf32> to vector<2x32xf32>
    %26 = arith.mulf %24, %3 : vector<2x32xf32>
    %27 = arith.mulf %23, %22 : vector<2x32xf32>
    %28 = arith.addf %26, %27 : vector<2x32xf32>
    %29 = math.tanh %28 : vector<2x32xf32>
    %30 = arith.mulf %25, %29 : vector<2x32xf32>
    %c1_i32 = arith.constant 1 : i32
    %31 = arith.index_cast %c1_i32 : i32 to index
    %c0_10 = arith.constant 0 : index
    %c0_11 = arith.constant 0 : index
    %32 = vector.load %arg0[%31, %c0_10, %c0_11] : memref<8x2x1xf32, #tpu.memory_space<vmem>>, vector<1x2x1xf32>
    %33 = vector.shape_cast %32 : vector<1x2x1xf32> to vector<2x1xf32>
    %34 = vector.broadcast %33 : vector<2x1xf32> to vector<2x128xf32>
    %35 = vector.broadcast %0 : vector<1x128xf32> to vector<2x128xf32>
    %36 = arith.mulf %34, %35 : vector<2x128xf32>
    %37 = vector.broadcast %1 : vector<1x128xf32> to vector<2x128xf32>
    %38 = arith.addf %36, %37 : vector<2x128xf32>
    %c0_12 = arith.constant 0 : index
    %c0_13 = arith.constant 0 : index
    %39 = vector.load %arg3[%c0_12, %c0_13] : memref<32x128xf32, #tpu.memory_space<vmem>>, vector<32x128xf32>
    %cst_14 = arith.constant dense<0.000000e+00> : vector<2x128xf32>
    %40 = tpu.matmul %30, %39, %cst_14 {dimension_numbers = #tpu.dot_dimension_numbers<[1], [0], [0], [1], [0, 0, 1, 1], [], []>} : vector<2x32xf32>, vector<32x128xf32>, vector<2x128xf32> -> vector<2x128xf32>
    %41 = arith.addf %38, %40 : vector<2x128xf32>
    %42 = vector.extract_strided_slice %41 {offsets = [0, 0], sizes = [2, 96], strides = [1, 1]} : vector<2x128xf32> to vector<2x96xf32>
    %43 = arith.negf %42 : vector<2x96xf32>
    %44 = math.exp %43 : vector<2x96xf32>
    %cst_15 = arith.constant 1.000000e+00 : f32
    %45 = vector.broadcast %cst_15 : f32 to vector<2x96xf32>
    %46 = arith.addf %45, %44 : vector<2x96xf32>
    %47 = arith.divf %45, %46 : vector<2x96xf32>
    %48 = vector.extract_strided_slice %41 {offsets = [0, 96], sizes = [2, 32], strides = [1, 1]} : vector<2x128xf32> to vector<2x32xf32>
    %49 = math.tanh %48 : vector<2x32xf32>
    %50 = vector.extract_strided_slice %47 {offsets = [0, 0], sizes = [2, 32], strides = [1, 1]} : vector<2x96xf32> to vector<2x32xf32>
    %51 = vector.extract_strided_slice %47 {offsets = [0, 32], sizes = [2, 32], strides = [1, 1]} : vector<2x96xf32> to vector<2x32xf32>
    %52 = vector.extract_strided_slice %47 {offsets = [0, 64], sizes = [2, 32], strides = [1, 1]} : vector<2x96xf32> to vector<2x32xf32>
    %53 = arith.mulf %51, %28 : vector<2x32xf32>
    %54 = arith.mulf %50, %49 : vector<2x32xf32>
    %55 = arith.addf %53, %54 : vector<2x32xf32>
    %56 = math.tanh %55 : vector<2x32xf32>
    %57 = arith.mulf %52, %56 : vector<2x32xf32>
    %c2_i32 = arith.constant 2 : i32
    %58 = arith.index_cast %c2_i32 : i32 to index
    %c0_16 = arith.constant 0 : index
    %c0_17 = arith.constant 0 : index
    %59 = vector.load %arg0[%58, %c0_16, %c0_17] : memref<8x2x1xf32, #tpu.memory_space<vmem>>, vector<1x2x1xf32>
    %60 = vector.shape_cast %59 : vector<1x2x1xf32> to vector<2x1xf32>
    %61 = vector.broadcast %60 : vector<2x1xf32> to vector<2x128xf32>
    %62 = vector.broadcast %0 : vector<1x128xf32> to vector<2x128xf32>
    %63 = arith.mulf %61, %62 : vector<2x128xf32>
    %64 = vector.broadcast %1 : vector<1x128xf32> to vector<2x128xf32>
    %65 = arith.addf %63, %64 : vector<2x128xf32>
    %c0_18 = arith.constant 0 : index
    %c0_19 = arith.constant 0 : index
    %66 = vector.load %arg3[%c0_18, %c0_19] : memref<32x128xf32, #tpu.memory_space<vmem>>, vector<32x128xf32>
    %cst_20 = arith.constant dense<0.000000e+00> : vector<2x128xf32>
    %67 = tpu.matmul %57, %66, %cst_20 {dimension_numbers = #tpu.dot_dimension_numbers<[1], [0], [0], [1], [0, 0, 1, 1], [], []>} : vector<2x32xf32>, vector<32x128xf32>, vector<2x128xf32> -> vector<2x128xf32>
    %68 = arith.addf %65, %67 : vector<2x128xf32>
    %69 = vector.extract_strided_slice %68 {offsets = [0, 0], sizes = [2, 96], strides = [1, 1]} : vector<2x128xf32> to vector<2x96xf32>
    %70 = arith.negf %69 : vector<2x96xf32>
    %71 = math.exp %70 : vector<2x96xf32>
    %cst_21 = arith.constant 1.000000e+00 : f32
    %72 = vector.broadcast %cst_21 : f32 to vector<2x96xf32>
    %73 = arith.addf %72, %71 : vector<2x96xf32>
    %74 = arith.divf %72, %73 : vector<2x96xf32>
    %75 = vector.extract_strided_slice %68 {offsets = [0, 96], sizes = [2, 32], strides = [1, 1]} : vector<2x128xf32> to vector<2x32xf32>
    %76 = math.tanh %75 : vector<2x32xf32>
    %77 = vector.extract_strided_slice %74 {offsets = [0, 0], sizes = [2, 32], strides = [1, 1]} : vector<2x96xf32> to vector<2x32xf32>
    %78 = vector.extract_strided_slice %74 {offsets = [0, 32], sizes = [2, 32], strides = [1, 1]} : vector<2x96xf32> to vector<2x32xf32>
    %79 = vector.extract_strided_slice %74 {offsets = [0, 64], sizes = [2, 32], strides = [1, 1]} : vector<2x96xf32> to vector<2x32xf32>
    %80 = arith.mulf %78, %55 : vector<2x32xf32>
    %81 = arith.mulf %77, %76 : vector<2x32xf32>
    %82 = arith.addf %80, %81 : vector<2x32xf32>
    %83 = math.tanh %82 : vector<2x32xf32>
    %84 = arith.mulf %79, %83 : vector<2x32xf32>
    %c3_i32 = arith.constant 3 : i32
    %85 = arith.index_cast %c3_i32 : i32 to index
    %c0_22 = arith.constant 0 : index
    %c0_23 = arith.constant 0 : index
    %86 = vector.load %arg0[%85, %c0_22, %c0_23] : memref<8x2x1xf32, #tpu.memory_space<vmem>>, vector<1x2x1xf32>
    %87 = vector.shape_cast %86 : vector<1x2x1xf32> to vector<2x1xf32>
    %88 = vector.broadcast %87 : vector<2x1xf32> to vector<2x128xf32>
    %89 = vector.broadcast %0 : vector<1x128xf32> to vector<2x128xf32>
    %90 = arith.mulf %88, %89 : vector<2x128xf32>
    %91 = vector.broadcast %1 : vector<1x128xf32> to vector<2x128xf32>
    %92 = arith.addf %90, %91 : vector<2x128xf32>
    %c0_24 = arith.constant 0 : index
    %c0_25 = arith.constant 0 : index
    %93 = vector.load %arg3[%c0_24, %c0_25] : memref<32x128xf32, #tpu.memory_space<vmem>>, vector<32x128xf32>
    %cst_26 = arith.constant dense<0.000000e+00> : vector<2x128xf32>
    %94 = tpu.matmul %84, %93, %cst_26 {dimension_numbers = #tpu.dot_dimension_numbers<[1], [0], [0], [1], [0, 0, 1, 1], [], []>} : vector<2x32xf32>, vector<32x128xf32>, vector<2x128xf32> -> vector<2x128xf32>
    %95 = arith.addf %92, %94 : vector<2x128xf32>
    %96 = vector.extract_strided_slice %95 {offsets = [0, 0], sizes = [2, 96], strides = [1, 1]} : vector<2x128xf32> to vector<2x96xf32>
    %97 = arith.negf %96 : vector<2x96xf32>
    %98 = math.exp %97 : vector<2x96xf32>
    %cst_27 = arith.constant 1.000000e+00 : f32
    %99 = vector.broadcast %cst_27 : f32 to vector<2x96xf32>
    %100 = arith.addf %99, %98 : vector<2x96xf32>
    %101 = arith.divf %99, %100 : vector<2x96xf32>
    %102 = vector.extract_strided_slice %95 {offsets = [0, 96], sizes = [2, 32], strides = [1, 1]} : vector<2x128xf32> to vector<2x32xf32>
    %103 = math.tanh %102 : vector<2x32xf32>
    %104 = vector.extract_strided_slice %101 {offsets = [0, 0], sizes = [2, 32], strides = [1, 1]} : vector<2x96xf32> to vector<2x32xf32>
    %105 = vector.extract_strided_slice %101 {offsets = [0, 32], sizes = [2, 32], strides = [1, 1]} : vector<2x96xf32> to vector<2x32xf32>
    %106 = vector.extract_strided_slice %101 {offsets = [0, 64], sizes = [2, 32], strides = [1, 1]} : vector<2x96xf32> to vector<2x32xf32>
    %107 = arith.mulf %105, %82 : vector<2x32xf32>
    %108 = arith.mulf %104, %103 : vector<2x32xf32>
    %109 = arith.addf %107, %108 : vector<2x32xf32>
    %110 = math.tanh %109 : vector<2x32xf32>
    %111 = arith.mulf %106, %110 : vector<2x32xf32>
    %c4_i32 = arith.constant 4 : i32
    %112 = arith.index_cast %c4_i32 : i32 to index
    %c0_28 = arith.constant 0 : index
    %c0_29 = arith.constant 0 : index
    %113 = vector.load %arg0[%112, %c0_28, %c0_29] : memref<8x2x1xf32, #tpu.memory_space<vmem>>, vector<1x2x1xf32>
    %114 = vector.shape_cast %113 : vector<1x2x1xf32> to vector<2x1xf32>
    %115 = vector.broadcast %114 : vector<2x1xf32> to vector<2x128xf32>
    %116 = vector.broadcast %0 : vector<1x128xf32> to vector<2x128xf32>
    %117 = arith.mulf %115, %116 : vector<2x128xf32>
    %118 = vector.broadcast %1 : vector<1x128xf32> to vector<2x128xf32>
    %119 = arith.addf %117, %118 : vector<2x128xf32>
    %c0_30 = arith.constant 0 : index
    %c0_31 = arith.constant 0 : index
    %120 = vector.load %arg3[%c0_30, %c0_31] : memref<32x128xf32, #tpu.memory_space<vmem>>, vector<32x128xf32>
    %cst_32 = arith.constant dense<0.000000e+00> : vector<2x128xf32>
    %121 = tpu.matmul %111, %120, %cst_32 {dimension_numbers = #tpu.dot_dimension_numbers<[1], [0], [0], [1], [0, 0, 1, 1], [], []>} : vector<2x32xf32>, vector<32x128xf32>, vector<2x128xf32> -> vector<2x128xf32>
    %122 = arith.addf %119, %121 : vector<2x128xf32>
    %123 = vector.extract_strided_slice %122 {offsets = [0, 0], sizes = [2, 96], strides = [1, 1]} : vector<2x128xf32> to vector<2x96xf32>
    %124 = arith.negf %123 : vector<2x96xf32>
    %125 = math.exp %124 : vector<2x96xf32>
    %cst_33 = arith.constant 1.000000e+00 : f32
    %126 = vector.broadcast %cst_33 : f32 to vector<2x96xf32>
    %127 = arith.addf %126, %125 : vector<2x96xf32>
    %128 = arith.divf %126, %127 : vector<2x96xf32>
    %129 = vector.extract_strided_slice %122 {offsets = [0, 96], sizes = [2, 32], strides = [1, 1]} : vector<2x128xf32> to vector<2x32xf32>
    %130 = math.tanh %129 : vector<2x32xf32>
    %131 = vector.extract_strided_slice %128 {offsets = [0, 0], sizes = [2, 32], strides = [1, 1]} : vector<2x96xf32> to vector<2x32xf32>
    %132 = vector.extract_strided_slice %128 {offsets = [0, 32], sizes = [2, 32], strides = [1, 1]} : vector<2x96xf32> to vector<2x32xf32>
    %133 = vector.extract_strided_slice %128 {offsets = [0, 64], sizes = [2, 32], strides = [1, 1]} : vector<2x96xf32> to vector<2x32xf32>
    %134 = arith.mulf %132, %109 : vector<2x32xf32>
    %135 = arith.mulf %131, %130 : vector<2x32xf32>
    %136 = arith.addf %134, %135 : vector<2x32xf32>
    %137 = math.tanh %136 : vector<2x32xf32>
    %138 = arith.mulf %133, %137 : vector<2x32xf32>
    %c5_i32 = arith.constant 5 : i32
    %139 = arith.index_cast %c5_i32 : i32 to index
    %c0_34 = arith.constant 0 : index
    %c0_35 = arith.constant 0 : index
    %140 = vector.load %arg0[%139, %c0_34, %c0_35] : memref<8x2x1xf32, #tpu.memory_space<vmem>>, vector<1x2x1xf32>
    %141 = vector.shape_cast %140 : vector<1x2x1xf32> to vector<2x1xf32>
    %142 = vector.broadcast %141 : vector<2x1xf32> to vector<2x128xf32>
    %143 = vector.broadcast %0 : vector<1x128xf32> to vector<2x128xf32>
    %144 = arith.mulf %142, %143 : vector<2x128xf32>
    %145 = vector.broadcast %1 : vector<1x128xf32> to vector<2x128xf32>
    %146 = arith.addf %144, %145 : vector<2x128xf32>
    %c0_36 = arith.constant 0 : index
    %c0_37 = arith.constant 0 : index
    %147 = vector.load %arg3[%c0_36, %c0_37] : memref<32x128xf32, #tpu.memory_space<vmem>>, vector<32x128xf32>
    %cst_38 = arith.constant dense<0.000000e+00> : vector<2x128xf32>
    %148 = tpu.matmul %138, %147, %cst_38 {dimension_numbers = #tpu.dot_dimension_numbers<[1], [0], [0], [1], [0, 0, 1, 1], [], []>} : vector<2x32xf32>, vector<32x128xf32>, vector<2x128xf32> -> vector<2x128xf32>
    %149 = arith.addf %146, %148 : vector<2x128xf32>
    %150 = vector.extract_strided_slice %149 {offsets = [0, 0], sizes = [2, 96], strides = [1, 1]} : vector<2x128xf32> to vector<2x96xf32>
    %151 = arith.negf %150 : vector<2x96xf32>
    %152 = math.exp %151 : vector<2x96xf32>
    %cst_39 = arith.constant 1.000000e+00 : f32
    %153 = vector.broadcast %cst_39 : f32 to vector<2x96xf32>
    %154 = arith.addf %153, %152 : vector<2x96xf32>
    %155 = arith.divf %153, %154 : vector<2x96xf32>
    %156 = vector.extract_strided_slice %149 {offsets = [0, 96], sizes = [2, 32], strides = [1, 1]} : vector<2x128xf32> to vector<2x32xf32>
    %157 = math.tanh %156 : vector<2x32xf32>
    %158 = vector.extract_strided_slice %155 {offsets = [0, 0], sizes = [2, 32], strides = [1, 1]} : vector<2x96xf32> to vector<2x32xf32>
    %159 = vector.extract_strided_slice %155 {offsets = [0, 32], sizes = [2, 32], strides = [1, 1]} : vector<2x96xf32> to vector<2x32xf32>
    %160 = vector.extract_strided_slice %155 {offsets = [0, 64], sizes = [2, 32], strides = [1, 1]} : vector<2x96xf32> to vector<2x32xf32>
    %161 = arith.mulf %159, %136 : vector<2x32xf32>
    %162 = arith.mulf %158, %157 : vector<2x32xf32>
    %163 = arith.addf %161, %162 : vector<2x32xf32>
    %164 = math.tanh %163 : vector<2x32xf32>
    %165 = arith.mulf %160, %164 : vector<2x32xf32>
    %c6_i32 = arith.constant 6 : i32
    %166 = arith.index_cast %c6_i32 : i32 to index
    %c0_40 = arith.constant 0 : index
    %c0_41 = arith.constant 0 : index
    %167 = vector.load %arg0[%166, %c0_40, %c0_41] : memref<8x2x1xf32, #tpu.memory_space<vmem>>, vector<1x2x1xf32>
    %168 = vector.shape_cast %167 : vector<1x2x1xf32> to vector<2x1xf32>
    %169 = vector.broadcast %168 : vector<2x1xf32> to vector<2x128xf32>
    %170 = vector.broadcast %0 : vector<1x128xf32> to vector<2x128xf32>
    %171 = arith.mulf %169, %170 : vector<2x128xf32>
    %172 = vector.broadcast %1 : vector<1x128xf32> to vector<2x128xf32>
    %173 = arith.addf %171, %172 : vector<2x128xf32>
    %c0_42 = arith.constant 0 : index
    %c0_43 = arith.constant 0 : index
    %174 = vector.load %arg3[%c0_42, %c0_43] : memref<32x128xf32, #tpu.memory_space<vmem>>, vector<32x128xf32>
    %cst_44 = arith.constant dense<0.000000e+00> : vector<2x128xf32>
    %175 = tpu.matmul %165, %174, %cst_44 {dimension_numbers = #tpu.dot_dimension_numbers<[1], [0], [0], [1], [0, 0, 1, 1], [], []>} : vector<2x32xf32>, vector<32x128xf32>, vector<2x128xf32> -> vector<2x128xf32>
    %176 = arith.addf %173, %175 : vector<2x128xf32>
    %177 = vector.extract_strided_slice %176 {offsets = [0, 0], sizes = [2, 96], strides = [1, 1]} : vector<2x128xf32> to vector<2x96xf32>
    %178 = arith.negf %177 : vector<2x96xf32>
    %179 = math.exp %178 : vector<2x96xf32>
    %cst_45 = arith.constant 1.000000e+00 : f32
    %180 = vector.broadcast %cst_45 : f32 to vector<2x96xf32>
    %181 = arith.addf %180, %179 : vector<2x96xf32>
    %182 = arith.divf %180, %181 : vector<2x96xf32>
    %183 = vector.extract_strided_slice %176 {offsets = [0, 96], sizes = [2, 32], strides = [1, 1]} : vector<2x128xf32> to vector<2x32xf32>
    %184 = math.tanh %183 : vector<2x32xf32>
    %185 = vector.extract_strided_slice %182 {offsets = [0, 0], sizes = [2, 32], strides = [1, 1]} : vector<2x96xf32> to vector<2x32xf32>
    %186 = vector.extract_strided_slice %182 {offsets = [0, 32], sizes = [2, 32], strides = [1, 1]} : vector<2x96xf32> to vector<2x32xf32>
    %187 = vector.extract_strided_slice %182 {offsets = [0, 64], sizes = [2, 32], strides = [1, 1]} : vector<2x96xf32> to vector<2x32xf32>
    %188 = arith.mulf %186, %163 : vector<2x32xf32>
    %189 = arith.mulf %185, %184 : vector<2x32xf32>
    %190 = arith.addf %188, %189 : vector<2x32xf32>
    %191 = math.tanh %190 : vector<2x32xf32>
    %192 = arith.mulf %187, %191 : vector<2x32xf32>
    %c7_i32 = arith.constant 7 : i32
    %193 = arith.index_cast %c7_i32 : i32 to index
    %c0_46 = arith.constant 0 : index
    %c0_47 = arith.constant 0 : index
    %194 = vector.load %arg0[%193, %c0_46, %c0_47] : memref<8x2x1xf32, #tpu.memory_space<vmem>>, vector<1x2x1xf32>
    %195 = vector.shape_cast %194 : vector<1x2x1xf32> to vector<2x1xf32>
    %196 = vector.broadcast %195 : vector<2x1xf32> to vector<2x128xf32>
    %197 = vector.broadcast %0 : vector<1x128xf32> to vector<2x128xf32>
    %198 = arith.mulf %196, %197 : vector<2x128xf32>
    %199 = vector.broadcast %1 : vector<1x128xf32> to vector<2x128xf32>
    %200 = arith.addf %198, %199 : vector<2x128xf32>
    %c0_48 = arith.constant 0 : index
    %c0_49 = arith.constant 0 : index
    %201 = vector.load %arg3[%c0_48, %c0_49] : memref<32x128xf32, #tpu.memory_space<vmem>>, vector<32x128xf32>
    %cst_50 = arith.constant dense<0.000000e+00> : vector<2x128xf32>
    %202 = tpu.matmul %192, %201, %cst_50 {dimension_numbers = #tpu.dot_dimension_numbers<[1], [0], [0], [1], [0, 0, 1, 1], [], []>} : vector<2x32xf32>, vector<32x128xf32>, vector<2x128xf32> -> vector<2x128xf32>
    %203 = arith.addf %200, %202 : vector<2x128xf32>
    %204 = vector.extract_strided_slice %203 {offsets = [0, 0], sizes = [2, 96], strides = [1, 1]} : vector<2x128xf32> to vector<2x96xf32>
    %205 = arith.negf %204 : vector<2x96xf32>
    %206 = math.exp %205 : vector<2x96xf32>
    %cst_51 = arith.constant 1.000000e+00 : f32
    %207 = vector.broadcast %cst_51 : f32 to vector<2x96xf32>
    %208 = arith.addf %207, %206 : vector<2x96xf32>
    %209 = arith.divf %207, %208 : vector<2x96xf32>
    %210 = vector.extract_strided_slice %203 {offsets = [0, 96], sizes = [2, 32], strides = [1, 1]} : vector<2x128xf32> to vector<2x32xf32>
    %211 = math.tanh %210 : vector<2x32xf32>
    %212 = vector.extract_strided_slice %209 {offsets = [0, 0], sizes = [2, 32], strides = [1, 1]} : vector<2x96xf32> to vector<2x32xf32>
    %213 = vector.extract_strided_slice %209 {offsets = [0, 32], sizes = [2, 32], strides = [1, 1]} : vector<2x96xf32> to vector<2x32xf32>
    %214 = vector.extract_strided_slice %209 {offsets = [0, 64], sizes = [2, 32], strides = [1, 1]} : vector<2x96xf32> to vector<2x32xf32>
    %215 = arith.mulf %213, %190 : vector<2x32xf32>
    %216 = arith.mulf %212, %211 : vector<2x32xf32>
    %217 = arith.addf %215, %216 : vector<2x32xf32>
    %218 = math.tanh %217 : vector<2x32xf32>
    %219 = arith.mulf %214, %218 : vector<2x32xf32>
    %c8_i32 = arith.constant 8 : i32
    %c0_52 = arith.constant 0 : index
    %c0_53 = arith.constant 0 : index
    %220 = vector.load %arg4[%c0_52, %c0_53] : memref<32x32xf32, #tpu.memory_space<vmem>>, vector<32x32xf32>
    %cst_54 = arith.constant dense<0.000000e+00> : vector<2x32xf32>
    %221 = tpu.matmul %219, %220, %cst_54 {dimension_numbers = #tpu.dot_dimension_numbers<[1], [0], [0], [1], [0, 0, 1, 1], [], []>} : vector<2x32xf32>, vector<32x32xf32>, vector<2x32xf32> -> vector<2x32xf32>
    %c0_55 = arith.constant 0 : index
    %c0_56 = arith.constant 0 : index
    %222 = vector.load %arg5[%c0_55, %c0_56] : memref<1x32xf32, #tpu.memory_space<vmem>>, vector<1x32xf32>
    %223 = vector.broadcast %222 : vector<1x32xf32> to vector<2x32xf32>
    %224 = arith.addf %221, %223 : vector<2x32xf32>
    %cst_57 = arith.constant 0.000000e+00 : f32
    %225 = vector.broadcast %cst_57 : f32 to vector<2x32xf32>
    %226 = arith.maximumf %224, %225 : vector<2x32xf32>
    %c0_58 = arith.constant 0 : index
    %c0_59 = arith.constant 0 : index
    %227 = vector.load %arg6[%c0_58, %c0_59] : memref<32x1xf32, #tpu.memory_space<vmem>>, vector<32x1xf32>
    %cst_60 = arith.constant dense<0.000000e+00> : vector<2x1xf32>
    %228 = tpu.matmul %226, %227, %cst_60 {dimension_numbers = #tpu.dot_dimension_numbers<[1], [0], [0], [1], [0, 0, 1, 1], [], []>} : vector<2x32xf32>, vector<32x1xf32>, vector<2x1xf32> -> vector<2x1xf32>
    %c0_61 = arith.constant 0 : index
    %c0_62 = arith.constant 0 : index
    %229 = vector.load %arg7[%c0_61, %c0_62] : memref<1x1xf32, #tpu.memory_space<vmem>>, vector<1x1xf32>
    %230 = vector.broadcast %229 : vector<1x1xf32> to vector<2x1xf32>
    %231 = arith.addf %228, %230 : vector<2x1xf32>
    %232 = arith.negf %231 : vector<2x1xf32>
    %233 = math.exp %232 : vector<2x1xf32>
    %cst_63 = arith.constant 1.000000e+00 : f32
    %234 = vector.broadcast %cst_63 : f32 to vector<2x1xf32>
    %235 = arith.addf %234, %233 : vector<2x1xf32>
    %236 = arith.divf %234, %235 : vector<2x1xf32>
    %c0_64 = arith.constant 0 : index
    %c0_65 = arith.constant 0 : index
    %237 = vector.load %arg8[%c0_64, %c0_65] : memref<2x1xf32, #tpu.memory_space<vmem>>, vector<2x1xf32>
    tpu.vector_store %arg8[%c0_64, %c0_65], %236 {strides = array<i32>} : memref<2x1xf32, #tpu.memory_space<vmem>>, vector<2x1xf32>,
    return
  }
}

</mosaic_0001>

<bundles_post_ra>
// kernel: tpu_custom_call.1
= control target key start
LH: loop header
LB: loop body
LE: loop exit
PB: predicated region body
PF: predicated region fallthrough
CT: control target
= control target key end

     0   :  { %s1687_s0 = inlined_call_operand.vmem [shape: f32[8,2,1], index: 0, kind: input, shape index: {}]   ;;  %s1688_s1 = inlined_call_operand.vmem [shape: f32[1,128], index: 1, kind: input, shape index: {}]   ;;  %s1689_s2 = inlined_call_operand.vmem [shape: f32[1,128], index: 2, kind: input, shape index: {}]   ;;  %s1690_s3 = inlined_call_operand.vmem [shape: f32[32,128], index: 3, kind: input, shape index: {}]   ;;  %s1691_s4 = inlined_call_operand.hbm [shape: f32[32,32], index: 4, kind: input, shape index: {}]   ;;  %s1692_s5 = inlined_call_operand.vmem [shape: f32[1,32], index: 5, kind: input, shape index: {}]   ;;  %s1693_s6 = inlined_call_operand.vmem [shape: f32[32,1], index: 6, kind: input, shape index: {}]   ;;  %s1694_s7 = inlined_call_operand.<no memory space> [shape: f32[1,1], index: 7, kind: input, shape index: {}]   ;;  %s1695_s8 = inlined_call_operand.vmem [shape: f32[2,1], index: 8, kind: output, shape index: {}]  }
   0x1   :  { %v13_v0 = vstv %s1694_s7 }
   0x2   :  { %14 = vst [vmem:[#allocation2] sm:$0x1] %v13_v0 }
   0x3   :  { %15 = vsyncpa [#allocation4], 0  ;;  %s1406_s29 = smov [#allocation3]  }
   0x4   :  { %s29_s30 = sshll.u32 %s1406_s29, 4  ;;  %s30_s30 = int_to_ptr.vmem [resolvable:$true] %s29_s30 }
   0x5   :  { %s1392_s9 = scalar_lea.vmem %s30_s30, 512  ;;  %p1397_p1 = scmp.lt.s32.totalorder %s30_s30, %s30_s30 }
   0x6   :  { %p1393_p0 = scmp.ne.s32.totalorder %s30_s30, %s1392_s9  ;;  %p1398_p2 = scmp.lt.s32.totalorder %s1392_s9, %s1392_s9 }
   0x8   :  { %p1399_p3 = por %p1398_p2, %p1397_p1 }
   0xa   :  { %p1400_p4 = pnand %p1399_p3, %p1393_p0 }
   0xc   :  { %1403 = shalt.err (!%p1400_p4)
}
   0xd   :  { %s1407_s10 = smov 128   ;;  %s1408_s11 = smov 8  }
   0xe   :  { %35 = dma.hbm_to_vmem [thread:$0]  %s1691_s4, 512, %s30_s30, [#allocation4], %s1407_s10, %s1407_s10, %s1408_s11  }
   0xf   :  { %1404 = dma.done.wait [#allocation4], 512  }
  0x10   :  { %1405 = vsyncadd [#allocation4], 4294966784  ;;  %v1409_v1 = vmov 0.0   ;;  %vm1410_vm0 = vmmov 0   ;;  %v1411_v2 = vmov 0   ;;  %v1474_v3 = vld [vmem:[%s1690_s3 + $0x18] sm:$0xff] }
  0x11   :  { %1196 = vmatprep.subr.mxu0 %v1409_v1  ;;  %1204 = vmatprep.mubr.msk.f32.mxu0 %vm1410_vm0, %v1409_v1  ;;  %v1479_v4 = vld [vmem:[%s1690_s3 + $0x10] sm:$0xff]  ;;  %v47_v5 = vld [vmem:[%s1687_s0] sm:$0x3]  ;;  %v1490_v6 = vld [vmem:[%s1690_s3 + $0x8] sm:$0xff]  ;;  %s1412_s25 = smov 32   ;;  %s1413_s26 = smov 64  }
  0x12   :  { %1314 = vset.pattern.permute.xlu0 %v1411_v2  ;;  %1207 = vmatprep.subr.mxu1 %v1409_v1  ;;  %v1498_v7 = vld [vmem:[%s1690_s3] sm:$0xff]  ;;  %vm71_vm1 = vcmask 261120   ;;  %vm1110_vm2 = vcmask 1024  }
  0x13   :  { %1215 = vmatprep.mubr.msk.f32.mxu1 %vm1410_vm0, %v1409_v1  ;;  %1315 = vset.pattern.permute.xlu1 %v1411_v2  ;;  %v1524_v9 = vld [vmem:[%s1688_s1] ss:$0 sm:$0xff]  ;;  %v1120_v27 = vld [vmem:[%s1687_s0 + $0x2] sm:$0x3]  ;;  %v1123_v48 = vld [vmem:[%s1687_s0 + $0x4] sm:$0x3] }
  0x14   :  { %1197 = vmatpush3.msra.mxu0 %v1474_v3  ;;  %1208 = vmatpush3.msra.mxu1 %v1474_v3  ;;  %v1530_v11 = vld [vmem:[%s1689_s2] ss:$0 sm:$0xff] }
  0x15   :  { %1198 = vmatprep.subr.mxu0 %v1409_v1  ;;  %50 = vperm.xlu0 %1314, %v47_v5  }
  0x16   :  { %1199 = vmatpush3.msra.mxu0 %v1479_v4  ;;  %1209 = vmatprep.subr.mxu1 %v1409_v1 }
  0x17   :  { %1200 = vmatprep.subr.mxu0 %v1409_v1  ;;  %1210 = vmatpush3.msra.mxu1 %v1479_v4 }
  0x18   :  { %1201 = vmatpush3.msra.mxu0 %v1490_v6  ;;  %1211 = vmatprep.subr.mxu1 %v1409_v1 }
  0x19   :  { %1202 = vmatprep.subr.mxu0 %v1409_v1  ;;  %1212 = vmatpush3.msra.mxu1 %v1490_v6 }
  0x1a   :  { %1203 = vmatpush3.msra.mxu0 %v1498_v7  ;;  %1213 = vmatprep.subr.mxu1 %v1409_v1 }
  0x1b   :  { %1205 = vmatmul.mubr.f32.vlgmr.msra.gmra.mxu0 %v1409_v1  ;;  %1214 = vmatpush3.msra.mxu1 %v1498_v7 }
  0x1c   :  { %1218 = vmatprep.subr.mxu0 %v1409_v1  ;;  %1226 = vmatprep.mubr.msk.f32.mxu0 %vm1410_vm0, %v1409_v1 }
  0x1d   :  { %1219 = vmatpush3.msra.mxu0 %v1474_v3  ;;  %1229 = vmatprep.subr.mxu1 %v1409_v1 }
  0x1e   :  { %1220 = vmatprep.subr.mxu0 %v1409_v1 }
  0x1f   :  { %1221 = vmatpush3.msra.mxu0 %v1479_v4 }
  0x20   :  { %1222 = vmatprep.subr.mxu0 %v1409_v1 }
  0x21   :  { %1223 = vmatpush3.msra.mxu0 %v1490_v6 }
  0x22   :  { %1224 = vmatprep.subr.mxu0 %v1409_v1 }
  0x23   :  { %1225 = vmatpush3.msra.mxu0 %v1498_v7 }
  0x24   :  { %1240 = vmatprep.subr.mxu0 %v1409_v1 }
  0x90   :  { %v51_v8 = vpop.permute.xlu0 %50 }
  0x91   :  { %v59_v10 = vmul.f32 %v1524_v9, %v51_v8 }
  0x93   :  { %v66_v12 = vadd.f32 %v1530_v11, %v59_v10 }
  0xdb   :  { %v141_v13 = vpop.f32.mrf.mxu0 }
  0xdc   :  { %v145_v14 = vadd.f32 %v141_v13, %v66_v12  ;;  %v1126_v12 = vld [vmem:[%s1687_s0 + $0x6] sm:$0x3] }
  0xdd   :  { %v1206_v15 = vpop.f32.mrf.mxu0 }
  0xde   :  { %1316 = vtanh.f32 %v145_v14  ;;  %v1119_v17 = vmul.f32 -1.442695, %v145_v14 }
  0xe0   :  { %1318 = vpow2.f32 %v1119_v17 }
  0xeb   :  { %v1317_v16 = vpop.eup %1316 }
  0xec   :  { %155 = vrot.lane.b32.xlu0 %v1317_v16, %s1412_s25 }
  0xed   :  { %v1319_v18 = vpop.eup %1318 }
  0xee   :  { %v149_v19 = vadd.f32 1.0, %v1319_v18 }
  0xf0   :  { %1320 = vrcp.f32 %v149_v19 }
  0xfd   :  { %v1321_v20 = vpop.eup %1320 }
  0xfe   :  { %v153_v23 = vmul.f32 0.0, %v1321_v20 }
 0x15e   :  { %v156_v21 = vpop.permute.xlu0 %155 }
 0x15f   :  { %v158_v22 = vmul.f32 %v1321_v20, %v156_v21 }
 0x161   :  { %160 = vrot.lane.b32.xlu1 %v158_v22, %s1412_s25 }
 0x1d3   :  { %v161_v24 = vpop.permute.xlu1 %160 }
 0x1d4   :  { %v163_v25 = vadd.f32 %v161_v24, %v153_v23 }
 0x1d6   :  { %1322 = vtanh.f32 %v163_v25 }
 0x1e3   :  { %v1323_v26 = vpop.eup %1322 }
 0x1e4   :  { %166 = vrot.lane.b32.xlu1 %v1323_v26, %s1412_s25 }
 0x1e8   :  { %174 = vperm.xlu1 %1315, %v1120_v27  }
 0x256   :  { %v167_v28 = vpop.permute.xlu1 %166 }
 0x257   :  { %v169_v29 = vmul.f32 %v1321_v20, %v167_v28 }
 0x259   :  { %180 = vrot.lane.b32.xlu0 %v169_v29, %s1413_s26 }
 0x263   :  { %v175_v31 = vpop.permute.xlu1 %174 }
 0x264   :  { %v177_v32 = vmul.f32 %v1524_v9, %v175_v31 }
 0x266   :  { %v178_v33 = vadd.f32 %v1530_v11, %v177_v32 }
 0x2cb   :  { %v181_v30 = vpop.permute.xlu0 %180 }
 0x2cc   :  { %1216 = vmatmul.mubr.msk.f32.vlgmr.msra.gmra.mxu1 %vm71_vm1, %v181_v30 }
 0x2cd   :  { %1230 = vmatpush3.msra.mxu1 %v1474_v3  ;;  %1237 = vmatprep.mubr.msk.f32.mxu1 %vm1410_vm0, %v1409_v1 }
 0x2ce   :  { %1231 = vmatprep.subr.mxu1 %v1409_v1 }
 0x2cf   :  { %1232 = vmatpush3.msra.mxu1 %v1479_v4 }
 0x2d0   :  { %1233 = vmatprep.subr.mxu1 %v1409_v1 }
 0x2d1   :  { %1234 = vmatpush3.msra.mxu1 %v1490_v6 }
 0x2d2   :  { %1235 = vmatprep.subr.mxu1 %v1409_v1 }
 0x2d3   :  { %1236 = vmatpush3.msra.mxu1 %v1498_v7 }
 0x2d4   :  { %1251 = vmatprep.subr.mxu1 %v1409_v1 }
 0x38c   :  { %v250_v34 = vpop.f32.mrf.mxu1 }
 0x38d   :  { %v254_v35 = vadd.f32 %v250_v34, %v178_v33  ;;  %v1129_v33 = vld [vmem:[%s1687_s0 + $0x8] sm:$0x3] }
 0x38e   :  { %v1217_v36 = vpop.f32.mrf.mxu1 }
 0x38f   :  { %1324 = vtanh.f32 %v254_v35  ;;  %v1122_v38 = vmul.f32 -1.442695, %v254_v35 }
 0x391   :  { %1326 = vpow2.f32 %v1122_v38 }
 0x39c   :  { %v1325_v37 = vpop.eup %1324 }
 0x39d   :  { %264 = vrot.lane.b32.xlu0 %v1325_v37, %s1412_s25 }
 0x39e   :  { %v1327_v39 = vpop.eup %1326 }
 0x39f   :  { %v258_v40 = vadd.f32 1.0, %v1327_v39 }
 0x3a1   :  { %1328 = vrcp.f32 %v258_v40 }
 0x3ae   :  { %v1329_v41 = vpop.eup %1328 }
 0x3af   :  { %v262_v44 = vmul.f32 %v1329_v41, %v163_v25 }
 0x40f   :  { %v265_v42 = vpop.permute.xlu0 %264 }
 0x410   :  { %v267_v43 = vmul.f32 %v1329_v41, %v265_v42 }
 0x412   :  { %269 = vrot.lane.b32.xlu1 %v267_v43, %s1412_s25 }
 0x484   :  { %v270_v45 = vpop.permute.xlu1 %269 }
 0x485   :  { %v272_v46 = vadd.f32 %v270_v45, %v262_v44 }
 0x487   :  { %1330 = vtanh.f32 %v272_v46 }
 0x494   :  { %v1331_v47 = vpop.eup %1330 }
 0x495   :  { %275 = vrot.lane.b32.xlu0 %v1331_v47, %s1412_s25 }
 0x499   :  { %283 = vperm.xlu0 %1314, %v1123_v48  }
 0x507   :  { %v276_v49 = vpop.permute.xlu0 %275 }
 0x508   :  { %v278_v50 = vmul.f32 %v1329_v41, %v276_v49 }
 0x50a   :  { %289 = vrot.lane.b32.xlu1 %v278_v50, %s1413_s26 }
 0x514   :  { %v284_v52 = vpop.permute.xlu0 %283 }
 0x515   :  { %v286_v53 = vmul.f32 %v1524_v9, %v284_v52 }
 0x517   :  { %v287_v54 = vadd.f32 %v1530_v11, %v286_v53 }
 0x57c   :  { %v290_v51 = vpop.permute.xlu1 %289 }
 0x57d   :  { %1227 = vmatmul.mubr.msk.f32.vlgmr.msra.gmra.mxu0 %vm71_vm1, %v290_v51 }
 0x57e   :  { %1241 = vmatpush3.msra.mxu0 %v1474_v3  ;;  %1248 = vmatprep.mubr.msk.f32.mxu0 %vm1410_vm0, %v1409_v1 }
 0x57f   :  { %1242 = vmatprep.subr.mxu0 %v1409_v1 }
 0x580   :  { %1243 = vmatpush3.msra.mxu0 %v1479_v4 }
 0x581   :  { %1244 = vmatprep.subr.mxu0 %v1409_v1 }
 0x582   :  { %1245 = vmatpush3.msra.mxu0 %v1490_v6 }
 0x583   :  { %1246 = vmatprep.subr.mxu0 %v1409_v1 }
 0x584   :  { %1247 = vmatpush3.msra.mxu0 %v1498_v7 }
 0x585   :  { %1262 = vmatprep.subr.mxu0 %v1409_v1 }
 0x63d   :  { %v359_v55 = vpop.f32.mrf.mxu0 }
 0x63e   :  { %v363_v56 = vadd.f32 %v359_v55, %v287_v54  ;;  %v1132_v54 = vld [vmem:[%s1687_s0 + $0xa] sm:$0x3] }
 0x63f   :  { %v1228_v57 = vpop.f32.mrf.mxu0 }
 0x640   :  { %1332 = vtanh.f32 %v363_v56  ;;  %v1125_v59 = vmul.f32 -1.442695, %v363_v56 }
 0x642   :  { %1334 = vpow2.f32 %v1125_v59 }
 0x64d   :  { %v1333_v58 = vpop.eup %1332 }
 0x64e   :  { %373 = vrot.lane.b32.xlu1 %v1333_v58, %s1412_s25 }
 0x64f   :  { %v1335_v60 = vpop.eup %1334 }
 0x650   :  { %v367_v61 = vadd.f32 1.0, %v1335_v60 }
 0x652   :  { %1336 = vrcp.f32 %v367_v61 }
 0x65f   :  { %v1337_v62 = vpop.eup %1336 }
 0x660   :  { %v371_v2 = vmul.f32 %v1337_v62, %v272_v46 }
 0x6c0   :  { %v374_v63 = vpop.permute.xlu1 %373 }
 0x6c1   :  { %v376_v0 = vmul.f32 %v1337_v62, %v374_v63 }
 0x6c3   :  { %378 = vrot.lane.b32.xlu0 %v376_v0, %s1412_s25 }
 0x735   :  { %v379_v5 = vpop.permute.xlu0 %378 }
 0x736   :  { %v381_v8 = vadd.f32 %v379_v5, %v371_v2 }
 0x738   :  { %1338 = vtanh.f32 %v381_v8 }
 0x745   :  { %v1339_v10 = vpop.eup %1338 }
 0x746   :  { %384 = vrot.lane.b32.xlu1 %v1339_v10, %s1412_s25 }
 0x74a   :  { %392 = vperm.xlu1 %1315, %v1126_v12  }
 0x7b8   :  { %v385_v13 = vpop.permute.xlu1 %384 }
 0x7b9   :  { %v387_v14 = vmul.f32 %v1337_v62, %v385_v13 }
 0x7bb   :  { %398 = vrot.lane.b32.xlu0 %v387_v14, %s1413_s26  ;;  %v1135_v14 = vld [vmem:[%s1687_s0 + $0xc] sm:$0x3] }
 0x7c5   :  { %v393_v16 = vpop.permute.xlu1 %392 }
 0x7c6   :  { %v395_v17 = vmul.f32 %v1524_v9, %v393_v16 }
 0x7c8   :  { %v396_v18 = vadd.f32 %v1530_v11, %v395_v17 }
 0x82d   :  { %v399_v15 = vpop.permute.xlu0 %398 }
 0x82e   :  { %1238 = vmatmul.mubr.msk.f32.vlgmr.msra.gmra.mxu1 %vm71_vm1, %v399_v15 }
 0x82f   :  { %1252 = vmatpush3.msra.mxu1 %v1474_v3  ;;  %1259 = vmatprep.mubr.msk.f32.mxu1 %vm1410_vm0, %v1409_v1 }
 0x830   :  { %1253 = vmatprep.subr.mxu1 %v1409_v1 }
 0x831   :  { %1254 = vmatpush3.msra.mxu1 %v1479_v4 }
 0x832   :  { %1255 = vmatprep.subr.mxu1 %v1409_v1 }
 0x833   :  { %1256 = vmatpush3.msra.mxu1 %v1490_v6 }
 0x834   :  { %1257 = vmatprep.subr.mxu1 %v1409_v1 }
 0x835   :  { %1258 = vmatpush3.msra.mxu1 %v1498_v7 }
 0x836   :  { %1273 = vmatprep.subr.mxu1 %v1409_v1 }
 0x8ee   :  { %v468_v19 = vpop.f32.mrf.mxu1 }
 0x8ef   :  { %v472_v20 = vadd.f32 %v468_v19, %v396_v18 }
 0x8f0   :  { %v1239_v21 = vpop.f32.mrf.mxu1 }
 0x8f1   :  { %1340 = vtanh.f32 %v472_v20  ;;  %v1128_v23 = vmul.f32 -1.442695, %v472_v20 }
 0x8f3   :  { %1342 = vpow2.f32 %v1128_v23 }
 0x8fe   :  { %v1341_v22 = vpop.eup %1340 }
 0x8ff   :  { %482 = vrot.lane.b32.xlu0 %v1341_v22, %s1412_s25 }
 0x900   :  { %v1343_v24 = vpop.eup %1342 }
 0x901   :  { %v476_v25 = vadd.f32 1.0, %v1343_v24 }
 0x903   :  { %1344 = vrcp.f32 %v476_v25 }
 0x910   :  { %v1345_v26 = vpop.eup %1344 }
 0x911   :  { %v480_v29 = vmul.f32 %v1345_v26, %v381_v8 }
 0x971   :  { %v483_v27 = vpop.permute.xlu0 %482 }
 0x972   :  { %v485_v28 = vmul.f32 %v1345_v26, %v483_v27 }
 0x974   :  { %487 = vrot.lane.b32.xlu1 %v485_v28, %s1412_s25 }
 0x9e6   :  { %v488_v30 = vpop.permute.xlu1 %487 }
 0x9e7   :  { %v490_v31 = vadd.f32 %v488_v30, %v480_v29 }
 0x9e9   :  { %1346 = vtanh.f32 %v490_v31 }
 0x9f6   :  { %v1347_v32 = vpop.eup %1346 }
 0x9f7   :  { %493 = vrot.lane.b32.xlu0 %v1347_v32, %s1412_s25 }
 0x9fb   :  { %501 = vperm.xlu0 %1314, %v1129_v33  }
 0xa69   :  { %v494_v34 = vpop.permute.xlu0 %493 }
 0xa6a   :  { %v496_v35 = vmul.f32 %v1345_v26, %v494_v34 }
 0xa6c   :  { %507 = vrot.lane.b32.xlu1 %v496_v35, %s1413_s26  ;;  %v1138_v35 = vld [vmem:[%s1687_s0 + $0xe] sm:$0x3] }
 0xa76   :  { %v502_v37 = vpop.permute.xlu0 %501 }
 0xa77   :  { %v504_v38 = vmul.f32 %v1524_v9, %v502_v37 }
 0xa79   :  { %v505_v39 = vadd.f32 %v1530_v11, %v504_v38 }
 0xade   :  { %v508_v36 = vpop.permute.xlu1 %507 }
 0xadf   :  { %1249 = vmatmul.mubr.msk.f32.vlgmr.msra.gmra.mxu0 %vm71_vm1, %v508_v36 }
 0xae0   :  { %1263 = vmatpush3.msra.mxu0 %v1474_v3  ;;  %1270 = vmatprep.mubr.msk.f32.mxu0 %vm1410_vm0, %v1409_v1 }
 0xae1   :  { %1264 = vmatprep.subr.mxu0 %v1409_v1 }
 0xae2   :  { %1265 = vmatpush3.msra.mxu0 %v1479_v4 }
 0xae3   :  { %1266 = vmatprep.subr.mxu0 %v1409_v1 }
 0xae4   :  { %1267 = vmatpush3.msra.mxu0 %v1490_v6 }
 0xae5   :  { %1268 = vmatprep.subr.mxu0 %v1409_v1 }
 0xae6   :  { %1269 = vmatpush3.msra.mxu0 %v1498_v7 }
 0xae7   :  { %1284 = vmatprep.subr.mxu0 %v1409_v1 }
 0xb9f   :  { %v577_v40 = vpop.f32.mrf.mxu0 }
 0xba0   :  { %v581_v41 = vadd.f32 %v577_v40, %v505_v39 }
 0xba1   :  { %v1250_v42 = vpop.f32.mrf.mxu0 }
 0xba2   :  { %1348 = vtanh.f32 %v581_v41  ;;  %v1131_v44 = vmul.f32 -1.442695, %v581_v41 }
 0xba4   :  { %1350 = vpow2.f32 %v1131_v44 }
 0xbaf   :  { %v1349_v43 = vpop.eup %1348 }
 0xbb0   :  { %591 = vrot.lane.b32.xlu1 %v1349_v43, %s1412_s25 }
 0xbb1   :  { %v1351_v45 = vpop.eup %1350 }
 0xbb2   :  { %v585_v46 = vadd.f32 1.0, %v1351_v45 }
 0xbb4   :  { %1352 = vrcp.f32 %v585_v46 }
 0xbc1   :  { %v1353_v47 = vpop.eup %1352 }
 0xbc2   :  { %v589_v50 = vmul.f32 %v1353_v47, %v490_v31 }
 0xc22   :  { %v592_v48 = vpop.permute.xlu1 %591 }
 0xc23   :  { %v594_v49 = vmul.f32 %v1353_v47, %v592_v48 }
 0xc25   :  { %596 = vrot.lane.b32.xlu0 %v594_v49, %s1412_s25 }
 0xc97   :  { %v597_v51 = vpop.permute.xlu0 %596 }
 0xc98   :  { %v599_v52 = vadd.f32 %v597_v51, %v589_v50 }
 0xc9a   :  { %1354 = vtanh.f32 %v599_v52 }
 0xca7   :  { %v1355_v53 = vpop.eup %1354 }
 0xca8   :  { %602 = vrot.lane.b32.xlu1 %v1355_v53, %s1412_s25  ;;  %v936_v53 = vld [vmem:[#allocation3 + $0x18] sm:$0xff] }
 0xcac   :  { %610 = vperm.xlu1 %1315, %v1132_v54   ;;  %v935_v54 = vld [vmem:[#allocation3 + $0x10] sm:$0xff] }
 0xd1a   :  { %v603_v55 = vpop.permute.xlu1 %602 }
 0xd1b   :  { %v605_v56 = vmul.f32 %v1353_v47, %v603_v55  ;;  %v934_v55 = vld [vmem:[#allocation3 + $0x8] sm:$0xff] }
 0xd1d   :  { %616 = vrot.lane.b32.xlu0 %v605_v56, %s1413_s26  ;;  %v933_v56 = vld [vmem:[#allocation3] sm:$0xff] }
 0xd27   :  { %v611_v58 = vpop.permute.xlu1 %610 }
 0xd8f   :  { %v617_v57 = vpop.permute.xlu0 %616 }
 0xd90   :  { %1260 = vmatmul.mubr.msk.f32.vlgmr.msra.gmra.mxu1 %vm71_vm1, %v617_v57 }
 0xd91   :  { %1274 = vmatpush3.msra.mxu1 %v1474_v3  ;;  %1281 = vmatprep.mubr.msk.f32.mxu1 %vm1410_vm0, %v1409_v1  ;;  %v613_v3 = vmul.f32 %v1524_v9, %v611_v58  ;;  %v1023_v58 = vld [vmem:[%s1693_s6 + $0x18] sm:$0xff] }
 0xd92   :  { %1275 = vmatprep.subr.mxu1 %v1409_v1 }
 0xd93   :  { %1276 = vmatpush3.msra.mxu1 %v1479_v4  ;;  %v614_v59 = vadd.f32 %v1530_v11, %v613_v3 }
 0xd94   :  { %1277 = vmatprep.subr.mxu1 %v1409_v1 }
 0xd95   :  { %1278 = vmatpush3.msra.mxu1 %v1490_v6 }
 0xd96   :  { %1279 = vmatprep.subr.mxu1 %v1409_v1 }
 0xd97   :  { %1280 = vmatpush3.msra.mxu1 %v1498_v7 }
 0xd98   :  { %1295 = vmatprep.subr.mxu1 %v1409_v1 }
 0xe50   :  { %v686_v60 = vpop.f32.mrf.mxu1 }
 0xe51   :  { %v690_v61 = vadd.f32 %v686_v60, %v614_v59 }
 0xe52   :  { %v1261_v62 = vpop.f32.mrf.mxu1 }
 0xe53   :  { %1356 = vtanh.f32 %v690_v61  ;;  %v1134_v63 = vmul.f32 -1.442695, %v690_v61  ;;  %v1022_v61 = vld [vmem:[%s1693_s6 + $0x10] sm:$0xff]  ;;  %v1021_v62 = vld [vmem:[%s1693_s6 + $0x8] sm:$0xff] }
 0xe55   :  { %1358 = vpow2.f32 %v1134_v63  ;;  %v1141_v63 = vld [vmem:[%s1692_s5] ss:$0 sm:$0xff] }
 0xe60   :  { %v1357_v4 = vpop.eup %1356 }
 0xe61   :  { %700 = vrot.lane.b32.xlu0 %v1357_v4, %s1412_s25  ;;  %v1020_v4 = vld [vmem:[%s1693_s6] sm:$0xff] }
 0xe62   :  { %v1359_v6 = vpop.eup %1358 }
 0xe63   :  { %v694_v0 = vadd.f32 1.0, %v1359_v6 }
 0xe65   :  { %1360 = vrcp.f32 %v694_v0 }
 0xe72   :  { %v1361_v7 = vpop.eup %1360 }
 0xe73   :  { %v698_v8 = vmul.f32 %v1361_v7, %v599_v52 }
 0xed3   :  { %v701_v2 = vpop.permute.xlu0 %700 }
 0xed4   :  { %v703_v5 = vmul.f32 %v1361_v7, %v701_v2 }
 0xed6   :  { %705 = vrot.lane.b32.xlu1 %v703_v5, %s1412_s25  ;;  %v1143_v5 = vld [vmem:[#allocation2] ss:$0 sm:$0xff] }
 0xf48   :  { %v706_v10 = vpop.permute.xlu1 %705 }
 0xf49   :  { %v708_v12 = vadd.f32 %v706_v10, %v698_v8 }
 0xf4b   :  { %1362 = vtanh.f32 %v708_v12 }
 0xf58   :  { %v1363_v13 = vpop.eup %1362 }
 0xf59   :  { %711 = vrot.lane.b32.xlu0 %v1363_v13, %s1412_s25 }
 0xf5d   :  { %719 = vperm.xlu0 %1314, %v1135_v14  }
 0xfcb   :  { %v712_v15 = vpop.permute.xlu0 %711 }
 0xfcc   :  { %v714_v16 = vmul.f32 %v1361_v7, %v712_v15 }
 0xfce   :  { %725 = vrot.lane.b32.xlu1 %v714_v16, %s1413_s26 }
 0xfd8   :  { %v720_v18 = vpop.permute.xlu0 %719 }
 0xfd9   :  { %v722_v19 = vmul.f32 %v1524_v9, %v720_v18 }
 0xfdb   :  { %v723_v20 = vadd.f32 %v1530_v11, %v722_v19 }
0x1040   :  { %v726_v17 = vpop.permute.xlu1 %725 }
0x1041   :  { %1271 = vmatmul.mubr.msk.f32.vlgmr.msra.gmra.mxu0 %vm71_vm1, %v726_v17 }
0x1042   :  { %1292 = vmatprep.mubr.msk.f32.mxu0 %vm1410_vm0, %v1409_v1  ;;  %1285 = vmatpush3.msra.mxu0 %v936_v53 }
0x1043   :  { %1286 = vmatprep.subr.mxu0 %v1409_v1 }
0x1044   :  { %1287 = vmatpush3.msra.mxu0 %v935_v54 }
0x1045   :  { %1288 = vmatprep.subr.mxu0 %v1409_v1 }
0x1046   :  { %1289 = vmatpush3.msra.mxu0 %v934_v55 }
0x1047   :  { %1290 = vmatprep.subr.mxu0 %v1409_v1 }
0x1048   :  { %1291 = vmatpush3.msra.mxu0 %v933_v56 }
0x1101   :  { %v795_v21 = vpop.f32.mrf.mxu0 }
0x1102   :  { %v799_v22 = vadd.f32 %v795_v21, %v723_v20 }
0x1103   :  { %v1272_v23 = vpop.f32.mrf.mxu0 }
0x1104   :  { %1364 = vtanh.f32 %v799_v22  ;;  %v1137_v25 = vmul.f32 -1.442695, %v799_v22 }
0x1106   :  { %1366 = vpow2.f32 %v1137_v25 }
0x1111   :  { %v1365_v24 = vpop.eup %1364 }
0x1112   :  { %809 = vrot.lane.b32.xlu1 %v1365_v24, %s1412_s25 }
0x1113   :  { %v1367_v26 = vpop.eup %1366 }
0x1114   :  { %v803_v27 = vadd.f32 1.0, %v1367_v26 }
0x1116   :  { %1368 = vrcp.f32 %v803_v27 }
0x1123   :  { %v1369_v28 = vpop.eup %1368 }
0x1124   :  { %v807_v31 = vmul.f32 %v1369_v28, %v708_v12 }
0x1184   :  { %v810_v29 = vpop.permute.xlu1 %809 }
0x1185   :  { %v812_v30 = vmul.f32 %v1369_v28, %v810_v29 }
0x1187   :  { %814 = vrot.lane.b32.xlu0 %v812_v30, %s1412_s25 }
0x11f9   :  { %v815_v32 = vpop.permute.xlu0 %814 }
0x11fa   :  { %v817_v33 = vadd.f32 %v815_v32, %v807_v31 }
0x11fc   :  { %1370 = vtanh.f32 %v817_v33 }
0x1209   :  { %v1371_v34 = vpop.eup %1370 }
0x120a   :  { %820 = vrot.lane.b32.xlu1 %v1371_v34, %s1412_s25 }
0x120e   :  { %828 = vperm.xlu1 %1315, %v1138_v35  }
0x127c   :  { %v821_v36 = vpop.permute.xlu1 %820 }
0x127d   :  { %v823_v37 = vmul.f32 %v1369_v28, %v821_v36 }
0x127f   :  { %834 = vrot.lane.b32.xlu0 %v823_v37, %s1413_s26 }
0x1289   :  { %v829_v39 = vpop.permute.xlu1 %828 }
0x128a   :  { %v831_v40 = vmul.f32 %v1524_v9, %v829_v39 }
0x128c   :  { %v832_v41 = vadd.f32 %v1530_v11, %v831_v40 }
0x12f1   :  { %v835_v38 = vpop.permute.xlu0 %834 }
0x12f2   :  { %1282 = vmatmul.mubr.msk.f32.vlgmr.msra.gmra.mxu1 %vm71_vm1, %v835_v38 }
0x12f3   :  { %1303 = vmatprep.mubr.msk.f32.mxu1 %vm1410_vm0, %v1409_v1  ;;  %1296 = vmatpush3.msra.mxu1 %v1023_v58 }
0x12f4   :  { %1297 = vmatprep.subr.mxu1 %v1409_v1 }
0x12f5   :  { %1298 = vmatpush3.msra.mxu1 %v1022_v61 }
0x12f6   :  { %1299 = vmatprep.subr.mxu1 %v1409_v1 }
0x12f7   :  { %1300 = vmatpush3.msra.mxu1 %v1021_v62 }
0x12f8   :  { %1301 = vmatprep.subr.mxu1 %v1409_v1 }
0x12f9   :  { %1302 = vmatpush3.msra.mxu1 %v1020_v4 }
0x13b2   :  { %v904_v42 = vpop.f32.mrf.mxu1 }
0x13b3   :  { %v908_v43 = vadd.f32 %v904_v42, %v832_v41 }
0x13b4   :  { %v1283_v44 = vpop.f32.mrf.mxu1 }
0x13b5   :  { %1372 = vtanh.f32 %v908_v43  ;;  %v1140_v46 = vmul.f32 -1.442695, %v908_v43 }
0x13b7   :  { %1374 = vpow2.f32 %v1140_v46 }
0x13c2   :  { %v1373_v45 = vpop.eup %1372 }
0x13c3   :  { %918 = vrot.lane.b32.xlu0 %v1373_v45, %s1412_s25 }
0x13c4   :  { %v1375_v47 = vpop.eup %1374 }
0x13c5   :  { %v912_v48 = vadd.f32 1.0, %v1375_v47 }
0x13c7   :  { %1376 = vrcp.f32 %v912_v48 }
0x13d4   :  { %v1377_v49 = vpop.eup %1376 }
0x13d5   :  { %v916_v9 = vmul.f32 %v1377_v49, %v817_v33 }
0x1435   :  { %v919_v50 = vpop.permute.xlu0 %918 }
0x1436   :  { %v921_v51 = vmul.f32 %v1377_v49, %v919_v50 }
0x1438   :  { %923 = vrot.lane.b32.xlu1 %v921_v51, %s1412_s25 }
0x14aa   :  { %v924_v52 = vpop.permute.xlu1 %923 }
0x14ab   :  { %v926_v11 = vadd.f32 %v924_v52, %v916_v9 }
0x14ad   :  { %1378 = vtanh.f32 %v926_v11 }
0x14ba   :  { %v1379_v57 = vpop.eup %1378 }
0x14bb   :  { %929 = vrot.lane.b32.xlu0 %v1379_v57, %s1412_s25 }
0x152d   :  { %v930_v3 = vpop.permute.xlu0 %929 }
0x152e   :  { %v932_v59 = vmul.f32 %v1377_v49, %v930_v3 }
0x1530   :  { %945 = vrot.lane.b32.xlu1 %v932_v59, %s1413_s26 }
0x15a2   :  { %v946_v60 = vpop.permute.xlu1 %945 }
0x15a3   :  { %1293 = vmatmul.mubr.msk.f32.vlgmr.msra.gmra.mxu0 %vm71_vm1, %v946_v60 }
0x1663   :  { %v1015_v6 = vpop.f32.mrf.mxu0 }
0x1664   :  { %v1016_v0 = vadd.f32 %v1141_v63, %v1015_v6 }
0x1665   :  { %v1294_v7 = vpop.f32.mrf.mxu0 }
0x1666   :  { %v1019_v2 = vmax.f32 %v1016_v0, 0.0 }
0x1668   :  { %1304 = vmatmul.mubr.msk.f32.vlgmr.msra.gmra.mxu1 %vm71_vm1, %v1019_v2 }
0x1728   :  { %v1100_v8 = vpop.f32.mrf.mxu1 }
0x1729   :  { %v1101_v10 = vadd.f32 %v1143_v5, %v1100_v8 }
0x172a   :  { %v1305_v12 = vpop.f32.mrf.mxu1 }
0x172b   :  { %v1145_v1 = vmul.f32 -1.442695, %v1101_v10 }
0x172d   :  { %1380 = vpow2.f32 %v1145_v1 }
0x173a   :  { %v1381_v13 = vpop.eup %1380 }
0x173b   :  { %v1107_v14 = vadd.f32 1.0, %v1381_v13 }
0x173d   :  { %1382 = vrcp.f32 %v1107_v14 }
0x174a   :  { %v1383_v15 = vpop.eup %1382 }
0x174b   :  { %1111 = vst.msk [vmem:[%s1695_s8] sm:$0x3] %vm1110_vm2, %v1383_v15 }
0x174c   :  { %1116 = vsyncpa [#allocation4], 1 }

</bundles_post_ra>
